<compile_context>
chip_gen: v6e
topology: v6e:2x2x1
jax: 0.10.0
libtpu: 0.0.40
codegen_flags: <defaults>
</compile_context>

<pallas_src>
import jax
import jax.numpy as jnp
from jax.experimental import pallas as pl
from jax.experimental.pallas import tpu as pltpu

LN_EPS = 1e-5  # torch.nn.LayerNorm default


def _round_up(x, m):
    return ((x + m - 1) // m) * m


# ---------------------------------------------------------------------------
# Fused kernel builder
# ---------------------------------------------------------------------------
def _build_fused_mlp_kernel(num_hidden, with_noise, sigma):
    """kernel([seed], x, [per-hidden: wT,b,g,beta]..., wT,b, o)."""

    def kernel(*refs):
        o_ref = refs[-1]
        idx = 0

        def take():
            nonlocal idx
            r = refs[idx]
            idx += 1
            return r

        if with_noise:
            seed_ref = take()                     # SMEM scalar seed
            pltpu.prng_seed(seed_ref[0])

        x = take()[...].astype(jnp.float32)       # [tile_b, in]

        def linear(x):
            wT_ref = take()                        # [in, out] (pre-transposed)
            b_ref = take()                         # [1, out] (f32)
            wT = wT_ref[...]
            b = b_ref[...]
            if with_noise:
                # In-kernel RNG: no weight-sized noise tensors streamed from HBM.
                nw = pltpu.stateful_normal(wT_ref.shape, jnp.float32) * sigma
                nb = pltpu.stateful_normal(b_ref.shape, jnp.float32) * sigma
                wT = (wT.astype(jnp.float32) + nw).astype(wT_ref.dtype)
                b = b + nb
            # bf16 operands on the MXU, f32 accumulation.
            return jnp.dot(x.astype(wT.dtype), wT,
                           preferred_element_type=jnp.float32) + b

        for _ in range(num_hidden):
            h = linear(x)                          # f32 [tile_b, hidden]
            g = take()[...]                        # [1, hidden] f32
            beta = take()[...]                     # [1, hidden] f32
            # LayerNorm (biased variance, like torch), affine folded in, all f32.
            mean = jnp.mean(h, axis=-1, keepdims=True)
            var = jnp.mean(jnp.square(h - mean), axis=-1, keepdims=True)
            scale = jax.lax.rsqrt(var + LN_EPS) * g
            shift = beta - mean * scale
            x = jnp.maximum(h * scale + shift, 0.0)   # ReLU

        # Final NoiseLinear, no activation (output_act=None default).
        o_ref[...] = linear(x)

    return kernel


# ---------------------------------------------------------------------------
# Parameter init (mirrors torch defaults; kernel-friendly layout / dtype)
# ---------------------------------------------------------------------------
def _init_linear(key, in_size, out_size, dtype):
    """nn.Linear default init: U(-1/sqrt(in), 1/sqrt(in)).

    Returns W pre-transposed to [in, out] in `dtype`; bias stays f32 as [1, out].
    """
    kw, kb = jax.random.split(key)
    bound = 1.0 / (in_size ** 0.5)
    w = jax.random.uniform(kw, (out_size, in_size), jnp.float32, -bound, bound)
    b = jax.random.uniform(kb, (out_size,), jnp.float32, -bound, bound)
    return w.T.astype(dtype), b.reshape(1, -1)


def init_mlp_params(key, hiddens, input_size, actions, param_dtype=jnp.bfloat16):
    params = []
    in_size = input_size
    for h in hiddens:
        key, sub = jax.random.split(key)
        wT, b = _init_linear(sub, in_size, h, param_dtype)
        params.append({
            "wT": wT,                                   # [in, h]  (bf16)
            "b": b,                                     # [1, h]   (f32)
            "gamma": jnp.ones((1, h), jnp.float32),     # LayerNorm weight
            "beta": jnp.zeros((1, h), jnp.float32),     # LayerNorm bias
        })
        in_size = h
    key, sub = jax.random.split(key)
    wT, b = _init_linear(sub, in_size, actions, param_dtype)
    params.append({"wT": wT, "b": b})
    return params


# ---------------------------------------------------------------------------
# Forward pass (single fused pallas_call)
# ---------------------------------------------------------------------------
def mlp_forward(params, x, sigma=0.0, noise_seed=0):
    """Equivalent to MLP.forward (sigma=0.0 matches the module default).

    When sigma != 0, pass a fresh `noise_seed` every call to resample noise
    like the PyTorch module does (the RNG stream itself differs from torch,
    only distributional equivalence is possible).
    """
    x = x.astype(jnp.float32)
    B, in_size = x.shape
    num_hidden = len(params) - 1
    actions = params[-1]["wT"].shape[1]
    with_noise = float(sigma) != 0.0          # trace-time branch

    # --- batch tiling: cdiv-based, multiple of 8, >=2 grid steps once B>=16 ---
    if B <= 8:
        tile_b = B
    else:
        tile_b = min(256, _round_up((B + 1) // 2, 8))
    B_pad = _round_up(B, tile_b)
    grid = (B_pad // tile_b,)
    if B_pad != B:
        x = jnp.pad(x, ((0, B_pad - B), (0, 0)))

    # --- lane-dense output: pad actions to a multiple of 128 lanes ---
    A_pad = _round_up(actions, 128)
    wT_last, b_last = params[-1]["wT"], params[-1]["b"]
    if A_pad != actions:
        wT_last = jnp.pad(wT_last, ((0, 0), (0, A_pad - actions)))
        b_last = jnp.pad(b_last, ((0, 0), (0, A_pad - actions)))

    def _const_spec(shape):
        return pl.BlockSpec(shape, lambda i: (0, 0))

    args, in_specs = [], []

    if with_noise:
        # TODO(synk): in-kernel PRNG stream cannot match torch's RNG; caller must
        # vary noise_seed per forward to resample noise each call.
        args.append(jnp.array([int(noise_seed)], jnp.int32))
        in_specs.append(pl.BlockSpec(memory_space=pltpu.MemorySpace.SMEM))

    args.append(x)
    in_specs.append(pl.BlockSpec((tile_b, in_size), lambda i: (i, 0)))

    flops = 0
    for layer in params[:-1]:
        args += [layer["wT"], layer["b"], layer["gamma"], layer["beta"]]
        in_specs += [_const_spec(layer["wT"].shape), _const_spec(layer["b"].shape),
                     _const_spec(layer["gamma"].shape), _const_spec(layer["beta"].shape)]
        flops += 2 * B_pad * layer["wT"].shape[0] * layer["wT"].shape[1]
    args += [wT_last, b_last]
    in_specs += [_const_spec(wT_last.shape), _const_spec(b_last.shape)]
    flops += 2 * B_pad * wT_last.shape[0] * wT_last.shape[1]

    bytes_accessed = int(sum(int(a.size) * a.dtype.itemsize for a in args)
                         + B_pad * A_pad * 4)
    cost = pl.CostEstimate(flops=int(flops),
                           transcendentals=int(num_hidden * B_pad),
                           bytes_accessed=bytes_accessed)

    # VMEM note (v7x, 64 MiB physical): at demo widths the resident weights are
    # KB-scale; if the MLP is widened (e.g. 4096-wide), single-buffer the
    # constant-index weight inputs or raise vmem_limit_bytes explicitly.
    kernel = _build_fused_mlp_kernel(num_hidden, with_noise, float(sigma))
    out = pl.pallas_call(
        kernel,
        out_shape=jax.ShapeDtypeStruct((B_pad, A_pad), jnp.float32),
        grid=grid,
        in_specs=in_specs,
        out_specs=pl.BlockSpec((tile_b, A_pad), lambda i: (i, 0)),
        compiler_params=pltpu.CompilerParams(
            dimension_semantics=("parallel",)),
        cost_estimate=cost,
    )(*args)
    return out[:B, :actions]


# ---------------------------------------------------------------------------
# Main
# ---------------------------------------------------------------------------
if __name__ == "__main__":
    INPUT_SIZE = 4
    ACTIONS = 4
    HIDDENS = (32, 32)
    BATCH = 2

    root = jax.random.PRNGKey(0)
    k_params, k_x = jax.random.split(root)

    params = init_mlp_params(k_params, HIDDENS, INPUT_SIZE, ACTIONS)
    x = jax.random.normal(k_x, (BATCH, INPUT_SIZE), jnp.float32)

    out = mlp_forward(params, x)              # sigma = 0.0 (module default)
    out = jax.block_until_ready(out)

    # Pure-JAX reference of the same math (same bf16 weights, f32 accumulation).
    def _ref(params, x):
        h = x.astype(jnp.float32)
        for layer in params[:-1]:
            hd = jnp.dot(h.astype(layer["wT"].dtype), layer["wT"],
                         preferred_element_type=jnp.float32) + layer["b"]
            m = hd.mean(-1, keepdims=True)
            v = jnp.square(hd - m).mean(-1, keepdims=True)
            hd = (hd - m) * jax.lax.rsqrt(v + LN_EPS) * layer["gamma"] + layer["beta"]
            h = jnp.maximum(hd, 0.0)
        last = params[-1]
        return jnp.dot(h.astype(last["wT"].dtype), last["wT"],
                       preferred_element_type=jnp.float32) + last["b"]

    ref = _ref(params, x)
    assert out.shape == (BATCH, ACTIONS)
    assert jnp.allclose(out, ref, atol=1e-3, rtol=1e-3), (out, ref)

    print("KERNEL_OK")
</pallas_src>

<mosaic_0001>
module attributes {stable_mosaic.version = 11 : i64} {
  func.func @kernel(%arg0: i32, %arg1: memref<2x4xf32, #tpu.memory_space<vmem>>, %arg2: memref<4x32xbf16, #tpu.memory_space<vmem>>, %arg3: memref<1x32xf32, #tpu.memory_space<vmem>>, %arg4: memref<1x32xf32, #tpu.memory_space<vmem>>, %arg5: memref<1x32xf32, #tpu.memory_space<vmem>>, %arg6: memref<32x32xbf16, #tpu.memory_space<vmem>>, %arg7: memref<1x32xf32, #tpu.memory_space<vmem>>, %arg8: memref<1x32xf32, #tpu.memory_space<vmem>>, %arg9: memref<1x32xf32, #tpu.memory_space<vmem>>, %arg10: memref<32x128xbf16, #tpu.memory_space<vmem>>, %arg11: memref<1x128xf32, #tpu.memory_space<vmem>>, %arg12: memref<2x128xf32, #tpu.memory_space<vmem>>) attributes {dimension_semantics = [#tpu.dimension_semantics<parallel>], iteration_bounds = array<i64: 1>, scalar_prefetch = 0 : i64, scratch_operands = 0 : i64, tpu.core_type = #tpu.core_type<tc>, window_params = [{transform_indices = @transform_0, window_bounds = array<i64: 2, 4>}, {pipeline_mode = #tpu.pipeline_mode<synchronous>, transform_indices = @transform_1, window_bounds = array<i64: 4, 32>}, {pipeline_mode = #tpu.pipeline_mode<synchronous>, transform_indices = @transform_2, window_bounds = array<i64: 1, 32>}, {pipeline_mode = #tpu.pipeline_mode<synchronous>, transform_indices = @transform_3, window_bounds = array<i64: 1, 32>}, {pipeline_mode = #tpu.pipeline_mode<synchronous>, transform_indices = @transform_4, window_bounds = array<i64: 1, 32>}, {pipeline_mode = #tpu.pipeline_mode<synchronous>, transform_indices = @transform_5, window_bounds = array<i64: 32, 32>}, {pipeline_mode = #tpu.pipeline_mode<synchronous>, transform_indices = @transform_6, window_bounds = array<i64: 1, 32>}, {pipeline_mode = #tpu.pipeline_mode<synchronous>, transform_indices = @transform_7, window_bounds = array<i64: 1, 32>}, {pipeline_mode = #tpu.pipeline_mode<synchronous>, transform_indices = @transform_8, window_bounds = array<i64: 1, 32>}, {pipeline_mode = #tpu.pipeline_mode<synchronous>, transform_indices = @transform_9, window_bounds = array<i64: 32, 128>}, {pipeline_mode = #tpu.pipeline_mode<synchronous>, transform_indices = @transform_10, window_bounds = array<i64: 1, 128>}, {transform_indices = @transform_11, window_bounds = array<i64: 2, 128>}]} {
    %c0 = arith.constant 0 : index
    %c0_0 = arith.constant 0 : index
    %0 = vector.load %arg1[%c0, %c0_0] : memref<2x4xf32, #tpu.memory_space<vmem>>, vector<2x4xf32>
    %c0_1 = arith.constant 0 : index
    %c0_2 = arith.constant 0 : index
    %1 = vector.load %arg2[%c0_1, %c0_2] : memref<4x32xbf16, #tpu.memory_space<vmem>>, vector<4x32xbf16>
    %c0_3 = arith.constant 0 : index
    %c0_4 = arith.constant 0 : index
    %2 = vector.load %arg3[%c0_3, %c0_4] : memref<1x32xf32, #tpu.memory_space<vmem>>, vector<1x32xf32>
    %3 = arith.truncf %0 : vector<2x4xf32> to vector<2x4xbf16>
    %cst = arith.constant dense<0.000000e+00> : vector<2x32xf32>
    %4 = tpu.matmul %3, %1, %cst {dimension_numbers = #tpu.dot_dimension_numbers<[1], [0], [0], [1], [0, 0, 1, 1], [], []>} : vector<2x4xbf16>, vector<4x32xbf16>, vector<2x32xf32> -> vector<2x32xf32>
    %5 = vector.broadcast %2 : vector<1x32xf32> to vector<2x32xf32>
    %6 = arith.addf %4, %5 : vector<2x32xf32>
    %c0_5 = arith.constant 0 : index
    %c0_6 = arith.constant 0 : index
    %7 = vector.load %arg4[%c0_5, %c0_6] : memref<1x32xf32, #tpu.memory_space<vmem>>, vector<1x32xf32>
    %c0_7 = arith.constant 0 : index
    %c0_8 = arith.constant 0 : index
    %8 = vector.load %arg5[%c0_7, %c0_8] : memref<1x32xf32, #tpu.memory_space<vmem>>, vector<1x32xf32>
    %cst_9 = arith.constant dense<0.000000e+00> : vector<2xf32>
    %9 = vector.multi_reduction <add>, %6, %cst_9 [1] : vector<2x32xf32> to vector<2xf32>
    %10 = vector.shape_cast %9 : vector<2xf32> to vector<2x1xf32>
    %cst_10 = arith.constant 3.200000e+01 : f32
    %11 = vector.broadcast %cst_10 : f32 to vector<2x1xf32>
    %12 = arith.divf %10, %11 : vector<2x1xf32>
    %13 = vector.broadcast %12 : vector<2x1xf32> to vector<2x32xf32>
    %14 = arith.subf %6, %13 : vector<2x32xf32>
    %15 = arith.mulf %14, %14 : vector<2x32xf32>
    %cst_11 = arith.constant dense<0.000000e+00> : vector<2xf32>
    %16 = vector.multi_reduction <add>, %15, %cst_11 [1] : vector<2x32xf32> to vector<2xf32>
    %17 = vector.shape_cast %16 : vector<2xf32> to vector<2x1xf32>
    %cst_12 = arith.constant 3.200000e+01 : f32
    %18 = vector.broadcast %cst_12 : f32 to vector<2x1xf32>
    %19 = arith.divf %17, %18 : vector<2x1xf32>
    %cst_13 = arith.constant 9.99999974E-6 : f32
    %20 = vector.broadcast %cst_13 : f32 to vector<2x1xf32>
    %21 = arith.addf %19, %20 : vector<2x1xf32>
    %22 = math.rsqrt %21 : vector<2x1xf32>
    %23 = vector.broadcast %22 : vector<2x1xf32> to vector<2x32xf32>
    %24 = vector.broadcast %7 : vector<1x32xf32> to vector<2x32xf32>
    %25 = arith.mulf %23, %24 : vector<2x32xf32>
    %26 = vector.broadcast %12 : vector<2x1xf32> to vector<2x32xf32>
    %27 = arith.mulf %26, %25 : vector<2x32xf32>
    %28 = vector.broadcast %8 : vector<1x32xf32> to vector<2x32xf32>
    %29 = arith.subf %28, %27 : vector<2x32xf32>
    %30 = arith.mulf %6, %25 : vector<2x32xf32>
    %31 = arith.addf %30, %29 : vector<2x32xf32>
    %cst_14 = arith.constant 0.000000e+00 : f32
    %32 = vector.broadcast %cst_14 : f32 to vector<2x32xf32>
    %33 = arith.maximumf %31, %32 : vector<2x32xf32>
    %c0_15 = arith.constant 0 : index
    %c0_16 = arith.constant 0 : index
    %34 = vector.load %arg6[%c0_15, %c0_16] : memref<32x32xbf16, #tpu.memory_space<vmem>>, vector<32x32xbf16>
    %c0_17 = arith.constant 0 : index
    %c0_18 = arith.constant 0 : index
    %35 = vector.load %arg7[%c0_17, %c0_18] : memref<1x32xf32, #tpu.memory_space<vmem>>, vector<1x32xf32>
    %36 = arith.truncf %33 : vector<2x32xf32> to vector<2x32xbf16>
    %cst_19 = arith.constant dense<0.000000e+00> : vector<2x32xf32>
    %37 = tpu.matmul %36, %34, %cst_19 {dimension_numbers = #tpu.dot_dimension_numbers<[1], [0], [0], [1], [0, 0, 1, 1], [], []>} : vector<2x32xbf16>, vector<32x32xbf16>, vector<2x32xf32> -> vector<2x32xf32>
    %38 = vector.broadcast %35 : vector<1x32xf32> to vector<2x32xf32>
    %39 = arith.addf %37, %38 : vector<2x32xf32>
    %c0_20 = arith.constant 0 : index
    %c0_21 = arith.constant 0 : index
    %40 = vector.load %arg8[%c0_20, %c0_21] : memref<1x32xf32, #tpu.memory_space<vmem>>, vector<1x32xf32>
    %c0_22 = arith.constant 0 : index
    %c0_23 = arith.constant 0 : index
    %41 = vector.load %arg9[%c0_22, %c0_23] : memref<1x32xf32, #tpu.memory_space<vmem>>, vector<1x32xf32>
    %cst_24 = arith.constant dense<0.000000e+00> : vector<2xf32>
    %42 = vector.multi_reduction <add>, %39, %cst_24 [1] : vector<2x32xf32> to vector<2xf32>
    %43 = vector.shape_cast %42 : vector<2xf32> to vector<2x1xf32>
    %cst_25 = arith.constant 3.200000e+01 : f32
    %44 = vector.broadcast %cst_25 : f32 to vector<2x1xf32>
    %45 = arith.divf %43, %44 : vector<2x1xf32>
    %46 = vector.broadcast %45 : vector<2x1xf32> to vector<2x32xf32>
    %47 = arith.subf %39, %46 : vector<2x32xf32>
    %48 = arith.mulf %47, %47 : vector<2x32xf32>
    %cst_26 = arith.constant dense<0.000000e+00> : vector<2xf32>
    %49 = vector.multi_reduction <add>, %48, %cst_26 [1] : vector<2x32xf32> to vector<2xf32>
    %50 = vector.shape_cast %49 : vector<2xf32> to vector<2x1xf32>
    %cst_27 = arith.constant 3.200000e+01 : f32
    %51 = vector.broadcast %cst_27 : f32 to vector<2x1xf32>
    %52 = arith.divf %50, %51 : vector<2x1xf32>
    %cst_28 = arith.constant 9.99999974E-6 : f32
    %53 = vector.broadcast %cst_28 : f32 to vector<2x1xf32>
    %54 = arith.addf %52, %53 : vector<2x1xf32>
    %55 = math.rsqrt %54 : vector<2x1xf32>
    %56 = vector.broadcast %55 : vector<2x1xf32> to vector<2x32xf32>
    %57 = vector.broadcast %40 : vector<1x32xf32> to vector<2x32xf32>
    %58 = arith.mulf %56, %57 : vector<2x32xf32>
    %59 = vector.broadcast %45 : vector<2x1xf32> to vector<2x32xf32>
    %60 = arith.mulf %59, %58 : vector<2x32xf32>
    %61 = vector.broadcast %41 : vector<1x32xf32> to vector<2x32xf32>
    %62 = arith.subf %61, %60 : vector<2x32xf32>
    %63 = arith.mulf %39, %58 : vector<2x32xf32>
    %64 = arith.addf %63, %62 : vector<2x32xf32>
    %cst_29 = arith.constant 0.000000e+00 : f32
    %65 = vector.broadcast %cst_29 : f32 to vector<2x32xf32>
    %66 = arith.maximumf %64, %65 : vector<2x32xf32>
    %c0_30 = arith.constant 0 : index
    %c0_31 = arith.constant 0 : index
    %67 = vector.load %arg10[%c0_30, %c0_31] : memref<32x128xbf16, #tpu.memory_space<vmem>>, vector<32x128xbf16>
    %c0_32 = arith.constant 0 : index
    %c0_33 = arith.constant 0 : index
    %68 = vector.load %arg11[%c0_32, %c0_33] : memref<1x128xf32, #tpu.memory_space<vmem>>, vector<1x128xf32>
    %69 = arith.truncf %66 : vector<2x32xf32> to vector<2x32xbf16>
    %cst_34 = arith.constant dense<0.000000e+00> : vector<2x128xf32>
    %70 = tpu.matmul %69, %67, %cst_34 {dimension_numbers = #tpu.dot_dimension_numbers<[1], [0], [0], [1], [0, 0, 1, 1], [], []>} : vector<2x32xbf16>, vector<32x128xbf16>, vector<2x128xf32> -> vector<2x128xf32>
    %71 = vector.broadcast %68 : vector<1x128xf32> to vector<2x128xf32>
    %72 = arith.addf %70, %71 : vector<2x128xf32>
    %c0_35 = arith.constant 0 : index
    %c0_36 = arith.constant 0 : index
    %73 = vector.load %arg12[%c0_35, %c0_36] : memref<2x128xf32, #tpu.memory_space<vmem>>, vector<2x128xf32>
    tpu.vector_store %arg12[%c0_35, %c0_36], %72 {strides = array<i32>} : memref<2x128xf32, #tpu.memory_space<vmem>>, vector<2x128xf32>,
    return
  }
  func.func @transform_0(%arg0: i32) -> (i32, i32) {
    %c0_i32 = arith.constant 0 : i32
    %c0_i32_0 = arith.constant 0 : i32
    return %arg0, %c0_i32 : i32, i32
  }
  func.func @transform_1(%arg0: i32) -> (i32, i32) {
    %c0_i32 = arith.constant 0 : i32
    %c0_i32_0 = arith.constant 0 : i32
    %c0_i32_1 = arith.constant 0 : i32
    return %c0_i32, %c0_i32_0 : i32, i32
  }
  func.func @transform_2(%arg0: i32) -> (i32, i32) {
    %c0_i32 = arith.constant 0 : i32
    %c0_i32_0 = arith.constant 0 : i32
    %c0_i32_1 = arith.constant 0 : i32
    return %c0_i32, %c0_i32_0 : i32, i32
  }
  func.func @transform_3(%arg0: i32) -> (i32, i32) {
    %c0_i32 = arith.constant 0 : i32
    %c0_i32_0 = arith.constant 0 : i32
    %c0_i32_1 = arith.constant 0 : i32
    return %c0_i32, %c0_i32_0 : i32, i32
  }
  func.func @transform_4(%arg0: i32) -> (i32, i32) {
    %c0_i32 = arith.constant 0 : i32
    %c0_i32_0 = arith.constant 0 : i32
    %c0_i32_1 = arith.constant 0 : i32
    return %c0_i32, %c0_i32_0 : i32, i32
  }
  func.func @transform_5(%arg0: i32) -> (i32, i32) {
    %c0_i32 = arith.constant 0 : i32
    %c0_i32_0 = arith.constant 0 : i32
    %c0_i32_1 = arith.constant 0 : i32
    return %c0_i32, %c0_i32_0 : i32, i32
  }
  func.func @transform_6(%arg0: i32) -> (i32, i32) {
    %c0_i32 = arith.constant 0 : i32
    %c0_i32_0 = arith.constant 0 : i32
    %c0_i32_1 = arith.constant 0 : i32
    return %c0_i32, %c0_i32_0 : i32, i32
  }
  func.func @transform_7(%arg0: i32) -> (i32, i32) {
    %c0_i32 = arith.constant 0 : i32
    %c0_i32_0 = arith.constant 0 : i32
    %c0_i32_1 = arith.constant 0 : i32
    return %c0_i32, %c0_i32_0 : i32, i32
  }
  func.func @transform_8(%arg0: i32) -> (i32, i32) {
    %c0_i32 = arith.constant 0 : i32
    %c0_i32_0 = arith.constant 0 : i32
    %c0_i32_1 = arith.constant 0 : i32
    return %c0_i32, %c0_i32_0 : i32, i32
  }
  func.func @transform_9(%arg0: i32) -> (i32, i32) {
    %c0_i32 = arith.constant 0 : i32
    %c0_i32_0 = arith.constant 0 : i32
    %c0_i32_1 = arith.constant 0 : i32
    return %c0_i32, %c0_i32_0 : i32, i32
  }
  func.func @transform_10(%arg0: i32) -> (i32, i32) {
    %c0_i32 = arith.constant 0 : i32
    %c0_i32_0 = arith.constant 0 : i32
    %c0_i32_1 = arith.constant 0 : i32
    return %c0_i32, %c0_i32_0 : i32, i32
  }
  func.func @transform_11(%arg0: i32) -> (i32, i32) {
    %c0_i32 = arith.constant 0 : i32
    %c0_i32_0 = arith.constant 0 : i32
    return %arg0, %c0_i32 : i32, i32
  }
}

</mosaic_0001>

<bundles_post_ra>
// kernel: tpu_custom_call.1
= control target key start
LH: loop header
LB: loop body
LE: loop exit
PB: predicated region body
PF: predicated region fallthrough
CT: control target
= control target key end

     0   :  { %16 = vsyncpa [#allocation3], 0  ;;  %s830_s0 = inlined_call_operand.hbm [shape: f32[2,4], index: 0, kind: input, shape index: {}]   ;;  %s831_s1 = inlined_call_operand.hbm [shape: bf16[4,32], index: 1, kind: input, shape index: {}]   ;;  %s832_s2 = inlined_call_operand.hbm [shape: f32[1,32], index: 2, kind: input, shape index: {}]   ;;  %s833_s3 = inlined_call_operand.hbm [shape: f32[1,32], index: 3, kind: input, shape index: {}]   ;;  %s834_s4 = inlined_call_operand.hbm [shape: f32[1,32], index: 4, kind: input, shape index: {}]   ;;  %s835_s5 = inlined_call_operand.hbm [shape: bf16[32,32], index: 5, kind: input, shape index: {}]   ;;  %s836_s6 = inlined_call_operand.hbm [shape: f32[1,32], index: 6, kind: input, shape index: {}]   ;;  %s837_s7 = inlined_call_operand.hbm [shape: f32[1,32], index: 7, kind: input, shape index: {}]   ;;  %s838_s8 = inlined_call_operand.hbm [shape: f32[1,32], index: 8, kind: input, shape index: {}]   ;;  %s839_s9 = inlined_call_operand.vmem [shape: bf16[32,128], index: 9, kind: input, shape index: {}]   ;;  %s840_s10 = inlined_call_operand.vmem [shape: f32[1,128], index: 10, kind: input, shape index: {}]   ;;  %s841_s11 = inlined_call_operand.hbm [shape: f32[2,128], index: 11, kind: output, shape index: {}]  }
   0x1   :  { %17 = vsyncpa [#allocation6], 0 }
   0x2   :  { %18 = vsyncpa [#allocation9], 0 }
   0x3   :  { %19 = vsyncpa [#allocation12], 0 }
   0x4   :  { %20 = vsyncpa [#allocation15], 0 }
   0x5   :  { %21 = vsyncpa [#allocation4], 0  ;;  %s703_s17 = smov [#allocation5]   ;;  %s704_s19 = smov [#allocation8]  }
   0x6   :  { %s38_s18 = sshll.u32 %s703_s17, 4  ;;  %s58_s20 = sshll.u32 %s704_s19, 4  ;;  %s39_s18 = int_to_ptr.vmem [resolvable:$true] %s38_s18  ;;  %s59_s20 = int_to_ptr.vmem [resolvable:$true] %s58_s20 }
   0x7   :  { %s499_s21 = scalar_lea.vmem %s39_s18, 32  ;;  %p504_p1 = scmp.lt.s32.totalorder %s39_s18, %s39_s18 }
   0x8   :  { %p500_p0 = scmp.ne.s32.totalorder %s39_s18, %s499_s21  ;;  %p505_p2 = scmp.lt.s32.totalorder %s499_s21, %s499_s21 }
   0xa   :  { %p506_p3 = por %p505_p2, %p504_p1 }
   0xc   :  { %p507_p4 = pnand %p506_p3, %p500_p0 }
   0xe   :  { %510 = shalt.err (!%p507_p4)
}
   0xf   :  { %41 = dma.hbm_to_vmem [thread:$0]  %s831_s1, 32, %s39_s18, [#allocation6]  }
  0x10   :  { %s519_s24 = scalar_lea.vmem %s59_s20, 16  ;;  %s523_s25 = scalar_lea.vmem %s59_s20, 32 }
  0x11   :  { %p520_p5 = scmp.ne.s32.totalorder %s59_s20, %s519_s24  ;;  %p524_p6 = scmp.lt.s32.totalorder %s59_s20, %s59_s20 }
  0x12   :  { %p525_p7 = scmp.lt.s32.totalorder %s523_s25, %s519_s24 }
  0x14   :  { %p526_p8 = por %p525_p7, %p524_p6 }
  0x16   :  { %p527_p9 = pnand %p526_p8, %p520_p5 }
  0x18   :  { %530 = shalt.err (!%p527_p9)
}
  0x19   :  { %61 = dma.hbm_to_vmem [thread:$0]  %s833_s3, 16, %s59_s20, [#allocation9]  }
  0x1a   :  { %s705_s28 = smov [#allocation11]  }
  0x1b   :  { %s77_s29 = sshll.u32 %s705_s28, 4  ;;  %s78_s29 = int_to_ptr.vmem [resolvable:$true] %s77_s29 }
  0x1c   :  { %s539_s30 = scalar_lea.vmem %s78_s29, 256  ;;  %p544_p11 = scmp.lt.s32.totalorder %s78_s29, %s78_s29 }
  0x1d   :  { %p540_p10 = scmp.ne.s32.totalorder %s78_s29, %s539_s30  ;;  %p545_p12 = scmp.lt.s32.totalorder %s539_s30, %s539_s30 }
  0x1f   :  { %p546_p13 = por %p545_p12, %p544_p11 }
  0x21   :  { %p547_p0 = pnand %p546_p13, %p540_p10 }
  0x23   :  { %550 = shalt.err (!%p547_p0)
}
  0x24   :  { %s706_s1 = smov 64   ;;  %s707_s12 = smov 4  }
  0x25   :  { %83 = dma.hbm_to_vmem [thread:$0]  %s835_s5, 256, %s78_s29, [#allocation12], %s706_s1, %s706_s1, %s707_s12  }
  0x26   :  { %s708_s15 = smov [#allocation14]   ;;  %s709_s3 = smov [#allocation2]  }
  0x27   :  { %s100_s16 = sshll.u32 %s708_s15, 4  ;;  %s28_s17 = sshll.u32 %s709_s3, 4  ;;  %s101_s16 = int_to_ptr.vmem [resolvable:$true] %s100_s16  ;;  %s29_s17 = int_to_ptr.vmem [resolvable:$true] %s28_s17 }
  0x28   :  { %s559_s18 = scalar_lea.vmem %s101_s16, 16  ;;  %s563_s19 = scalar_lea.vmem %s101_s16, 32 }
  0x29   :  { %p560_p1 = scmp.ne.s32.totalorder %s101_s16, %s559_s18  ;;  %p564_p2 = scmp.lt.s32.totalorder %s101_s16, %s101_s16 }
  0x2a   :  { %p565_p3 = scmp.lt.s32.totalorder %s563_s19, %s559_s18 }
  0x2c   :  { %p566_p4 = por %p565_p3, %p564_p2 }
  0x2e   :  { %p567_p5 = pnand %p566_p4, %p560_p1 }
  0x30   :  { %570 = shalt.err (!%p567_p5)
}
  0x31   :  { %103 = dma.hbm_to_vmem [thread:$0]  %s837_s7, 16, %s101_s16, [#allocation15]  }
  0x32   :  { %s579_s22 = scalar_lea.vmem %s29_s17, 32  ;;  %p584_p7 = scmp.lt.s32.totalorder %s29_s17, %s29_s17 }
  0x33   :  { %p580_p6 = scmp.ne.s32.totalorder %s29_s17, %s579_s22  ;;  %p585_p8 = scmp.lt.s32.totalorder %s579_s22, %s579_s22 }
  0x35   :  { %p586_p9 = por %p585_p8, %p584_p7 }
  0x37   :  { %p587_p10 = pnand %p586_p9, %p580_p6 }
  0x39   :  { %590 = shalt.err (!%p587_p10)
}
  0x3a   :  { %31 = dma.hbm_to_vmem [thread:$0]  %s830_s0, 32, %s29_s17, [#allocation3]  }
  0x3b   :  { %s710_s24 = smov [#allocation7]   ;;  %s711_s26 = smov [#allocation10]  }
  0x3c   :  { %s48_s25 = sshll.u32 %s710_s24, 4  ;;  %s68_s27 = sshll.u32 %s711_s26, 4  ;;  %s49_s25 = int_to_ptr.vmem [resolvable:$true] %s48_s25  ;;  %s69_s27 = int_to_ptr.vmem [resolvable:$true] %s68_s27 }
  0x3d   :  { %s599_s28 = scalar_lea.vmem %s49_s25, 16  ;;  %s603_s7 = scalar_lea.vmem %s49_s25, 32 }
  0x3e   :  { %p600_p11 = scmp.ne.s32.totalorder %s49_s25, %s599_s28  ;;  %p604_p12 = scmp.lt.s32.totalorder %s49_s25, %s49_s25 }
  0x3f   :  { %p605_p13 = scmp.lt.s32.totalorder %s603_s7, %s599_s28 }
  0x41   :  { %p606_p0 = por %p605_p13, %p604_p12 }
  0x43   :  { %p607_p1 = pnand %p606_p0, %p600_p11 }
  0x45   :  { %610 = shalt.err (!%p607_p1)
}
  0x46   :  { %51 = dma.hbm_to_vmem [thread:$0]  %s832_s2, 16, %s49_s25, [#allocation6]  }
  0x47   :  { %s619_s1 = scalar_lea.vmem %s69_s27, 16  ;;  %s623_s0 = scalar_lea.vmem %s69_s27, 32 }
  0x48   :  { %p620_p2 = scmp.ne.s32.totalorder %s69_s27, %s619_s1  ;;  %p624_p3 = scmp.lt.s32.totalorder %s69_s27, %s69_s27 }
  0x49   :  { %p625_p4 = scmp.lt.s32.totalorder %s623_s0, %s619_s1 }
  0x4b   :  { %p626_p5 = por %p625_p4, %p624_p3 }
  0x4d   :  { %p627_p6 = pnand %p626_p5, %p620_p2 }
  0x4f   :  { %630 = shalt.err (!%p627_p6)
}
  0x50   :  { %71 = dma.hbm_to_vmem [thread:$0]  %s834_s4, 16, %s69_s27, [#allocation9]  }
  0x51   :  { %s712_s14 = smov [#allocation13]   ;;  %s713_s16 = smov [#allocation16]  }
  0x52   :  { %s90_s15 = sshll.u32 %s712_s14, 4  ;;  %s110_s3 = sshll.u32 %s713_s16, 4  ;;  %s91_s15 = int_to_ptr.vmem [resolvable:$true] %s90_s15  ;;  %s111_s3 = int_to_ptr.vmem [resolvable:$true] %s110_s3 }
  0x53   :  { %s639_s17 = scalar_lea.vmem %s91_s15, 16  ;;  %s643_s2 = scalar_lea.vmem %s91_s15, 32 }
  0x54   :  { %p640_p7 = scmp.ne.s32.totalorder %s91_s15, %s639_s17  ;;  %p644_p8 = scmp.lt.s32.totalorder %s91_s15, %s91_s15 }
  0x55   :  { %p645_p9 = scmp.lt.s32.totalorder %s643_s2, %s639_s17 }
  0x57   :  { %p646_p10 = por %p645_p9, %p644_p8 }
  0x59   :  { %p647_p11 = pnand %p646_p10, %p640_p7 }
  0x5b   :  { %650 = shalt.err (!%p647_p11)
}
  0x5c   :  { %93 = dma.hbm_to_vmem [thread:$0]  %s836_s6, 16, %s91_s15, [#allocation12]  }
  0x5d   :  { %s659_s20 = scalar_lea.vmem %s111_s3, 16  ;;  %s663_s4 = scalar_lea.vmem %s111_s3, 32 }
  0x5e   :  { %p660_p12 = scmp.ne.s32.totalorder %s111_s3, %s659_s20  ;;  %p664_p13 = scmp.lt.s32.totalorder %s111_s3, %s111_s3 }
  0x5f   :  { %p665_p0 = scmp.lt.s32.totalorder %s663_s4, %s659_s20 }
  0x61   :  { %p666_p1 = por %p665_p0, %p664_p13 }
  0x63   :  { %p667_p2 = pnand %p666_p1, %p660_p12 }
  0x65   :  { %670 = shalt.err (!%p667_p2)
}
  0x66   :  { %113 = dma.hbm_to_vmem [thread:$0]  %s838_s8, 16, %s111_s3, [#allocation15]  }
  0x67   :  { %691 = dma.done.wait [#allocation3], 32  }
  0x68   :  { %692 = vsyncadd [#allocation3], 4294967264 }
  0x69   :  { %693 = dma.done.wait [#allocation6], 48  }
  0x6a   :  { %694 = vsyncadd [#allocation6], 4294967248 }
  0x6b   :  { %695 = dma.done.wait [#allocation9], 32  }
  0x6c   :  { %696 = vsyncadd [#allocation9], 4294967264 }
  0x6d   :  { %697 = dma.done.wait [#allocation12], 272  }
  0x6e   :  { %698 = vsyncadd [#allocation12], 4294967024 }
  0x6f   :  { %699 = dma.done.wait [#allocation15], 32  }
  0x70   :  { %700 = vsyncadd [#allocation15], 4294967264  ;;  %v714_v0 = vmov 0.0   ;;  %vm715_vm0 = vmmov 0   ;;  %vm160_vm1 = vcmask 1041408   ;;  %vm156_vm2 = vcmask 31744  }
  0x71   :  { %447 = vmatprep.subr.bf16.mxu0 %v714_v0  ;;  %449 = vmatprep.mubr.msk.bf16.mxu0 %vm715_vm0, %v714_v0  ;;  %v147_v1 = vld [vmem:[#allocation5] sm:$0x3]  ;;  %v146_v2 = vld [vmem:[#allocation2] sm:$0x3]  ;;  %v425_v5 = vld [vmem:[#allocation7] ss:$0 sm:$0xff] }
  0x72   :  { %453 = vmatprep.subr.bf16.mxu1 %v714_v0  ;;  %457 = vmatprep.mubr.msk.bf16.mxu1 %vm715_vm0, %v714_v0  ;;  %v162_v3 = vsel %vm160_vm1, %v147_v1, 0  ;;  %v149_v4 = vpack.c.bf16 %v146_v2, %v146_v2  ;;  %vm206_vm3 = vcmask 254976   ;;  %v483_v17 = vld [vmem:[#allocation11 + $0x8] sm:$0xff]   ;;  %v484_v18 = vld [vmem:[#allocation11] sm:$0xff]   ;;  %v427_v22 = vld [vmem:[#allocation8] ss:$0 sm:$0xff] }
  0x73   :  { %448 = vmatpush3.bf16.msra.mxu0 %v162_v3  ;;  %454 = vmatpush3.bf16.msra.mxu1 %v483_v17  ;;  %v428_v25 = vld [vmem:[#allocation10] ss:$0 sm:$0xff]  ;;  %vm262_vm4 = vcmask 261120   ;;  %v429_v32 = vld [vmem:[#allocation13] ss:$0 sm:$0xff]  ;;  %v486_v45 = vld [vmem:[%s839_s9] sm:$0xff]  }
  0x74   :  { %461 = vmatprep.subr.bf16.mxu0 %v714_v0  ;;  %455 = vmatprep.subr.bf16.mxu1 %v714_v0  ;;  %v485_v44 = vld [vmem:[%s839_s9 + $0x8] sm:$0xff]   ;;  %v433_v49 = vld [vmem:[#allocation14] ss:$0 sm:$0xff]  ;;  %v434_v52 = vld [vmem:[#allocation16] ss:$0 sm:$0xff]  ;;  %s716_s25 = smov [#allocation17]  }
  0x75   :  { %v435_v59 = vld [vmem:[%s840_s10] ss:$0 sm:$0xff]  ;;  %s412_s26 = sshll.u32 %s716_s25, 4  ;;  %s413_s26 = int_to_ptr.vmem [resolvable:$true] %s412_s26 }
  0x76   :  { %450 = vmatmul.mubr.msk.bf16.vlgmr.msra.gmra.mxu0 %vm156_vm2, %v149_v4  ;;  %s671_s27 = scalar_lea.vmem %s413_s26, 32  ;;  %p676_p4 = scmp.lt.s32.totalorder %s413_s26, %s413_s26 }
  0x77   :  { %465 = vmatprep.mubr.msk.bf16.mxu0 %vm715_vm0, %v714_v0  ;;  %456 = vmatpush3.bf16.msra.mxu1 %v484_v18  ;;  %p672_p3 = scmp.ne.s32.totalorder %s413_s26, %s671_s27  ;;  %p677_p5 = scmp.lt.s32.totalorder %s671_s27, %s671_s27 }
  0x78   :  { %462 = vmatpush3.bf16.msra.mxu0 %v485_v44 }
  0x79   :  { %463 = vmatprep.subr.bf16.mxu0 %v714_v0  ;;  %p678_p6 = por %p677_p5, %p676_p4 }
  0x7b   :  { %p679_p7 = pnand %p678_p6, %p672_p3 }
  0x7c   :  { %464 = vmatpush3.bf16.msra.mxu0 %v486_v45 }
 0x136   :  { %v198_v6 = vpop.f32.mrf.mxu0 }
 0x137   :  { %v199_v7 = vadd.f32 %v425_v5, %v198_v6 }
 0x138   :  { %v451_v8 = vpop.f32.mrf.mxu0 }
 0x139   :  { %v207_v9 = vsel %vm206_vm3, %v199_v7, 0.0 }
 0x13a   :  { %208 = vadd.xlane.f32.xlu0 %v207_v9  ;;  %v201_v10 = vpop.f32.mrf.mxu0 }
 0x13c   :  { %v452_v11 = vpop.f32.mrf.mxu0 }
 0x1c3   :  { %v209_v12 = vpop.xlane.xlu0 %208 }
 0x1c4   :  { %v211_v13 = vmul.f32 0.03125, %v209_v12 }
 0x1c6   :  { %v212_v14 = vsub.f32 %v199_v7, %v211_v13 }
 0x1c8   :  { %v213_v15 = vmul.f32 %v212_v14, %v212_v14 }
 0x1ca   :  { %v214_v16 = vsel %vm206_vm3, %v213_v15, 0.0 }
 0x1cb   :  { %215 = vadd.xlane.f32.xlu0 %v214_v16 }
 0x254   :  { %v216_v19 = vpop.xlane.xlu0 %215 }
 0x255   :  { %v217_v20 = vmul.f32 0.03125, %v216_v19 }
 0x257   :  { %v218_v21 = vadd.f32 1e-05, %v217_v20 }
 0x259   :  { %487 = vrsqrt.f32 %v218_v21 }
 0x266   :  { %v488_v23 = vpop.eup %487 }
 0x267   :  { %v226_v24 = vmul.f32 %v488_v23, %v427_v22 }
 0x269   :  { %v227_v26 = vmul.f32 %v226_v24, %v211_v13  ;;  %v235_v28 = vmul.f32 %v226_v24, %v199_v7 }
 0x26b   :  { %v234_v27 = vsub.f32 %v428_v25, %v227_v26 }
 0x26d   :  { %v236_v29 = vadd.f32 %v235_v28, %v234_v27 }
 0x26f   :  { %v237_v30 = vmax.f32 %v236_v29, 0.0 }
 0x271   :  { %v243_v31 = vpack.c.bf16 %v237_v30, %v237_v30 }
 0x273   :  { %458 = vmatmul.mubr.msk.bf16.vlgmr.msra.gmra.mxu1 %vm262_vm4, %v243_v31 }
 0x333   :  { %v300_v33 = vpop.f32.mrf.mxu1 }
 0x334   :  { %v301_v34 = vadd.f32 %v429_v32, %v300_v33 }
 0x335   :  { %v459_v35 = vpop.f32.mrf.mxu1 }
 0x336   :  { %v308_v36 = vsel %vm206_vm3, %v301_v34, 0.0 }
 0x337   :  { %309 = vadd.xlane.f32.xlu1 %v308_v36  ;;  %v303_v37 = vpop.f32.mrf.mxu1 }
 0x339   :  { %v460_v38 = vpop.f32.mrf.mxu1 }
 0x3c0   :  { %v310_v39 = vpop.xlane.xlu1 %309 }
 0x3c1   :  { %v311_v40 = vmul.f32 0.03125, %v310_v39 }
 0x3c3   :  { %v312_v41 = vsub.f32 %v301_v34, %v311_v40 }
 0x3c5   :  { %v313_v42 = vmul.f32 %v312_v41, %v312_v41 }
 0x3c7   :  { %v314_v43 = vsel %vm206_vm3, %v313_v42, 0.0 }
 0x3c8   :  { %315 = vadd.xlane.f32.xlu1 %v314_v43 }
 0x451   :  { %v316_v46 = vpop.xlane.xlu1 %315 }
 0x452   :  { %v317_v47 = vmul.f32 0.03125, %v316_v46 }
 0x454   :  { %v318_v48 = vadd.f32 1e-05, %v317_v47 }
 0x456   :  { %489 = vrsqrt.f32 %v318_v48 }
 0x463   :  { %v490_v50 = vpop.eup %489 }
 0x464   :  { %v326_v51 = vmul.f32 %v490_v50, %v433_v49 }
 0x466   :  { %v327_v53 = vmul.f32 %v326_v51, %v311_v40  ;;  %v335_v55 = vmul.f32 %v326_v51, %v301_v34 }
 0x468   :  { %v334_v54 = vsub.f32 %v434_v52, %v327_v53 }
 0x46a   :  { %v336_v56 = vadd.f32 %v335_v55, %v334_v54 }
 0x46c   :  { %v337_v57 = vmax.f32 %v336_v56, 0.0 }
 0x46e   :  { %v343_v58 = vpack.c.bf16 %v337_v57, %v337_v57 }
 0x470   :  { %466 = vmatmul.mubr.msk.bf16.vlgmr.msra.gmra.mxu0 %vm262_vm4, %v343_v58 }
 0x530   :  { %v399_v60 = vpop.f32.mrf.mxu0 }
 0x531   :  { %v400_v61 = vadd.f32 %v435_v59, %v399_v60 }
 0x532   :  { %v467_v62 = vpop.f32.mrf.mxu0 }
 0x533   :  { %405 = vst [vmem:[#allocation17] sm:$0x3] %v400_v61 }
 0x534   :  { %v402_v63 = vpop.f32.mrf.mxu0 }
 0x535   :  { %682 = shalt.err (!%p679_p7)
}
 0x536   :  { %415 = dma.vmem_to_hbm [thread:$0]  %s413_s26, 32, %s841_s11, [#allocation4]   ;;  %v468_v0 = vpop.f32.mrf.mxu0 }
 0x537   :  { %701 = dma.done.wait [#allocation4], 32  }
 0x538   :  { %702 = vsyncadd [#allocation4], 4294967264 }
 0x539   :  { %419 = vsyncpa [#allocation3], 1 }
 0x53a   :  { %420 = vsyncpa [#allocation6], 1 }
 0x53b   :  { %421 = vsyncpa [#allocation9], 1 }
 0x53c   :  { %422 = vsyncpa [#allocation12], 1 }
 0x53d   :  { %423 = vsyncpa [#allocation15], 1 }
 0x53e   :  { %424 = vsyncpa [#allocation4], 1 }

</bundles_post_ra>
